<compile_context>
chip_gen: v7x
topology: tpu7x:2x2x1
jax: 0.10.0
libtpu: 0.0.40
codegen_flags: <defaults>
</compile_context>

<pallas_src>
import functools

import jax
import jax.numpy as jnp
from jax import lax
from jax.experimental import pallas as pl
from jax.experimental.pallas import tpu as pltpu

BN_EPS = 1e-5


# ----------------------------------------------------------------------------
# Fused kernel: Conv2d (im2col matmul) + BatchNorm2d(train) + ReLU + MaxPool2d
# ----------------------------------------------------------------------------
def _conv_bn_relu_pool_kernel(xc_ref, w_ref, gamma_ref, beta_ref, o_ref,
                              *, b, ho, wo, hp, wp, pk, ps):
    m_rows = b * ho * wo

    # Conv2d (no bias): one (B*HO*WO, K*K*C_in) x (K*K*C_in, C_out) bf16 MXU
    # matmul with f32 accumulation.
    y = jnp.dot(xc_ref[...], w_ref[...], preferred_element_type=jnp.float32)

    # BatchNorm2d, training-mode forward (biased batch variance over N,H,W),
    # statistics in a single sweep, folded into a per-channel affine.
    inv_m = 1.0 / m_rows
    s1 = jnp.sum(y, axis=0, keepdims=True)            # (1, C)
    s2 = jnp.sum(y * y, axis=0, keepdims=True)        # (1, C)
    mean = s1 * inv_m
    var = jnp.maximum(s2 * inv_m - mean * mean, 0.0)
    scale = gamma_ref[...] * lax.rsqrt(var + BN_EPS)   # (1, C)
    bias = beta_ref[...] - mean * scale                # (1, C)

    # ReLU; activation stays a value, channels lane-dense.
    h = jnp.maximum(y * scale + bias, 0.0)             # (M, C)

    # MaxPool2d(pk, ps), vectorized.  Flat row r = bb*HO*WO + i*WO + j.
    # 1) running max over pk consecutive flat rows == max over window columns.
    ncol = m_rows - (pk - 1)
    colmax = h[0:ncol]
    for d in range(1, pk):
        colmax = jnp.maximum(colmax, h[d:d + ncol])
    # 2) running max over pk conv rows (flat stride WO) == max over window rows.
    nrow = ncol - (pk - 1) * wo
    winmax = colmax[0:nrow]
    for d in range(1, pk):
        winmax = jnp.maximum(winmax, colmax[d * wo:d * wo + nrow])
    # 3) store the window-start rows directly into the flat lane-dense output.
    for bb in range(b):
        for oi in range(hp):
            for oj in range(wp):
                m = (bb * hp + oi) * wp + oj
                r0 = bb * ho * wo + (ps * oi) * wo + ps * oj
                o_ref[pl.ds(m, 1), :] = winmax[r0:r0 + 1, :].astype(o_ref.dtype)


# ----------------------------------------------------------------------------
# Wrapper: layout glue (NCHW -> NHWC, im2col, bf16 cast) + one pallas_call
# ----------------------------------------------------------------------------
def first_conv_block(x_nchw, w_col, gamma, beta, *, kernel, stride,
                     pool_kernel=3, pool_stride=2):
    """x_nchw: (B, C_in, H, W) like the PyTorch module. Returns (B, C_out, Hp, Wp)."""
    b, c_in, h, w = x_nchw.shape
    k, s = kernel, stride
    ho = (h - k) // s + 1
    wo = (w - k) // s + 1
    hp = (ho - pool_kernel) // pool_stride + 1
    wp = (wo - pool_kernel) // pool_stride + 1
    c_out = w_col.shape[1]

    # --- XLA glue (layout plumbing only; fuses into one copy fusion). -------
    x_nhwc = jnp.transpose(x_nchw, (0, 2, 3, 1))
    cols = []
    for di in range(k):                      # feature order: (kh, kw, c_in)
        for dj in range(k):
            sl = lax.slice(
                x_nhwc,
                (0, di, dj, 0),
                (b, di + s * (ho - 1) + 1, dj + s * (wo - 1) + 1, c_in),
                (1, s, s, 1))                # (B, HO, WO, C_in)
            cols.append(sl)
    patches = (jnp.concatenate(cols, axis=-1)
               .reshape(b * ho * wo, k * k * c_in)
               .astype(jnp.bfloat16))
    w_bf16 = w_col.astype(jnp.bfloat16)
    gamma2 = gamma.reshape(1, c_out).astype(jnp.float32)
    beta2 = beta.reshape(1, c_out).astype(jnp.float32)

    kernel_fn = functools.partial(_conv_bn_relu_pool_kernel, b=b, ho=ho, wo=wo,
                                  hp=hp, wp=wp, pk=pool_kernel, ps=pool_stride)
    vmem = pltpu.MemorySpace.VMEM
    out_flat = pl.pallas_call(
        kernel_fn,
        out_shape=jax.ShapeDtypeStruct((b * hp * wp, c_out), jnp.float32),
        in_specs=[pl.BlockSpec(memory_space=vmem)] * 4,
        out_specs=pl.BlockSpec(memory_space=vmem),
    )(patches, w_bf16, gamma2, beta2)

    # Back to NCHW only for parity with the PyTorch module's output layout;
    # a consumer that accepts the flat lane-dense (B*Hp*Wp, C) form can skip it.
    out_nhwc = out_flat.reshape(b, hp, wp, c_out)
    return jnp.transpose(out_nhwc, (0, 3, 1, 2))


# ----------------------------------------------------------------------------
# Pure-JAX reference (independent path, HIGHEST-precision conv) for validation
# ----------------------------------------------------------------------------
def reference_forward(x_nchw, w_col, gamma, beta, *, kernel, stride,
                      pool_kernel=3, pool_stride=2):
    c_in = x_nchw.shape[1]
    c_out = w_col.shape[1]
    k = kernel
    # w_col rows are ordered (kh, kw, c_in) -> PyTorch OIHW layout.
    w_oihw = jnp.transpose(w_col.reshape(k, k, c_in, c_out), (3, 2, 0, 1))
    y = lax.conv_general_dilated(x_nchw, w_oihw, (stride, stride), "VALID",
                                 dimension_numbers=("NCHW", "OIHW", "NCHW"),
                                 precision=lax.Precision.HIGHEST)
    mean = jnp.mean(y, axis=(0, 2, 3), keepdims=True)
    var = jnp.mean((y - mean) ** 2, axis=(0, 2, 3), keepdims=True)
    hbn = (y - mean) / jnp.sqrt(var + BN_EPS) * gamma.reshape(1, c_out, 1, 1) \
        + beta.reshape(1, c_out, 1, 1)
    hact = jnp.maximum(hbn, 0.0)
    return lax.reduce_window(hact, -jnp.inf, lax.max,
                             (1, 1, pool_kernel, pool_kernel),
                             (1, 1, pool_stride, pool_stride), "VALID")


if __name__ == "__main__":
    # Small shapes consistent with FirstConvBlock: x = (B, C_in, H, W).
    B, C_IN, H, W = 2, 4, 16, 16
    C_OUT, K, S = 128, 3, 2          # conv: kernel 3, stride 2, no pad, no bias
    POOL_K, POOL_S = 3, 2            # fixed in the module

    root = jax.random.PRNGKey(0)
    kx, kw, kg, kb = jax.random.split(root, 4)
    x = jax.random.normal(kx, (B, C_IN, H, W), jnp.float32)
    # Conv weight kept in im2col layout (K*K*C_in, C_out), rows = (kh, kw, c_in).
    w_col = 0.05 * jax.random.normal(kw, (K * K * C_IN, C_OUT), jnp.float32)
    gamma = 1.0 + 0.1 * jax.random.normal(kg, (1, C_OUT), jnp.float32)
    beta = 0.05 * jax.random.normal(kb, (1, C_OUT), jnp.float32)

    fwd = jax.jit(functools.partial(first_conv_block, kernel=K, stride=S,
                                    pool_kernel=POOL_K, pool_stride=POOL_S))
    out = jax.block_until_ready(fwd(x, w_col, gamma, beta))

    ho = (H - K) // S + 1
    hp = (ho - POOL_K) // POOL_S + 1
    assert out.shape == (B, C_OUT, hp, hp), out.shape

    ref = jax.block_until_ready(
        reference_forward(x, w_col, gamma, beta, kernel=K, stride=S,
                          pool_kernel=POOL_K, pool_stride=POOL_S))
    max_err = float(jnp.max(jnp.abs(out - ref)))
    assert jnp.allclose(out, ref, rtol=2e-2, atol=2e-2), max_err

    print("KERNEL_OK")
</pallas_src>

<mosaic_0001>
module attributes {stable_mosaic.version = 11 : i64} {
  func.func @_conv_bn_relu_pool_kernel(%arg0: memref<98x36xbf16, #tpu.memory_space<vmem>>, %arg1: memref<36x128xbf16, #tpu.memory_space<vmem>>, %arg2: memref<1x128xf32, #tpu.memory_space<vmem>>, %arg3: memref<1x128xf32, #tpu.memory_space<vmem>>, %arg4: memref<18x128xf32, #tpu.memory_space<vmem>>) attributes {dimension_semantics = [], scalar_prefetch = 0 : i64, scratch_operands = 0 : i64, tpu.core_type = #tpu.core_type<tc>} {
    %c0 = arith.constant 0 : index
    %c0_0 = arith.constant 0 : index
    %0 = vector.load %arg0[%c0, %c0_0] : memref<98x36xbf16, #tpu.memory_space<vmem>>, vector<98x36xbf16>
    %c0_1 = arith.constant 0 : index
    %c0_2 = arith.constant 0 : index
    %1 = vector.load %arg1[%c0_1, %c0_2] : memref<36x128xbf16, #tpu.memory_space<vmem>>, vector<36x128xbf16>
    %cst = arith.constant dense<0.000000e+00> : vector<98x128xf32>
    %2 = tpu.matmul %0, %1, %cst {dimension_numbers = #tpu.dot_dimension_numbers<[1], [0], [0], [1], [0, 0, 1, 1], [], []>} : vector<98x36xbf16>, vector<36x128xbf16>, vector<98x128xf32> -> vector<98x128xf32>
    %cst_3 = arith.constant dense<0.000000e+00> : vector<128xf32>
    %3 = vector.multi_reduction <add>, %2, %cst_3 [0] : vector<98x128xf32> to vector<128xf32>
    %4 = vector.shape_cast %3 : vector<128xf32> to vector<1x128xf32>
    %5 = arith.mulf %2, %2 : vector<98x128xf32>
    %cst_4 = arith.constant dense<0.000000e+00> : vector<128xf32>
    %6 = vector.multi_reduction <add>, %5, %cst_4 [0] : vector<98x128xf32> to vector<128xf32>
    %7 = vector.shape_cast %6 : vector<128xf32> to vector<1x128xf32>
    %cst_5 = arith.constant 0.0102040814 : f32
    %8 = vector.broadcast %cst_5 : f32 to vector<1x128xf32>
    %9 = arith.mulf %4, %8 : vector<1x128xf32>
    %cst_6 = arith.constant 0.0102040814 : f32
    %10 = vector.broadcast %cst_6 : f32 to vector<1x128xf32>
    %11 = arith.mulf %7, %10 : vector<1x128xf32>
    %12 = arith.mulf %9, %9 : vector<1x128xf32>
    %13 = arith.subf %11, %12 : vector<1x128xf32>
    %cst_7 = arith.constant 0.000000e+00 : f32
    %14 = vector.broadcast %cst_7 : f32 to vector<1x128xf32>
    %15 = arith.maximumf %13, %14 : vector<1x128xf32>
    %c0_8 = arith.constant 0 : index
    %c0_9 = arith.constant 0 : index
    %16 = vector.load %arg2[%c0_8, %c0_9] : memref<1x128xf32, #tpu.memory_space<vmem>>, vector<1x128xf32>
    %cst_10 = arith.constant 9.99999974E-6 : f32
    %17 = vector.broadcast %cst_10 : f32 to vector<1x128xf32>
    %18 = arith.addf %15, %17 : vector<1x128xf32>
    %19 = math.rsqrt %18 : vector<1x128xf32>
    %20 = arith.mulf %16, %19 : vector<1x128xf32>
    %c0_11 = arith.constant 0 : index
    %c0_12 = arith.constant 0 : index
    %21 = vector.load %arg3[%c0_11, %c0_12] : memref<1x128xf32, #tpu.memory_space<vmem>>, vector<1x128xf32>
    %22 = arith.mulf %9, %20 : vector<1x128xf32>
    %23 = arith.subf %21, %22 : vector<1x128xf32>
    %24 = vector.broadcast %20 : vector<1x128xf32> to vector<98x128xf32>
    %25 = arith.mulf %2, %24 : vector<98x128xf32>
    %26 = vector.broadcast %23 : vector<1x128xf32> to vector<98x128xf32>
    %27 = arith.addf %25, %26 : vector<98x128xf32>
    %cst_13 = arith.constant 0.000000e+00 : f32
    %28 = vector.broadcast %cst_13 : f32 to vector<98x128xf32>
    %29 = arith.maximumf %27, %28 : vector<98x128xf32>
    %30 = vector.extract_strided_slice %29 {offsets = [0, 0], sizes = [96, 128], strides = [1, 1]} : vector<98x128xf32> to vector<96x128xf32>
    %31 = vector.extract_strided_slice %29 {offsets = [1, 0], sizes = [96, 128], strides = [1, 1]} : vector<98x128xf32> to vector<96x128xf32>
    %32 = arith.maximumf %30, %31 : vector<96x128xf32>
    %33 = vector.extract_strided_slice %29 {offsets = [2, 0], sizes = [96, 128], strides = [1, 1]} : vector<98x128xf32> to vector<96x128xf32>
    %34 = arith.maximumf %32, %33 : vector<96x128xf32>
    %35 = vector.extract_strided_slice %34 {offsets = [0, 0], sizes = [82, 128], strides = [1, 1]} : vector<96x128xf32> to vector<82x128xf32>
    %36 = vector.extract_strided_slice %34 {offsets = [7, 0], sizes = [82, 128], strides = [1, 1]} : vector<96x128xf32> to vector<82x128xf32>
    %37 = arith.maximumf %35, %36 : vector<82x128xf32>
    %38 = vector.extract_strided_slice %34 {offsets = [14, 0], sizes = [82, 128], strides = [1, 1]} : vector<96x128xf32> to vector<82x128xf32>
    %39 = arith.maximumf %37, %38 : vector<82x128xf32>
    %40 = vector.extract_strided_slice %39 {offsets = [0, 0], sizes = [1, 128], strides = [1, 1]} : vector<82x128xf32> to vector<1x128xf32>
    %c0_14 = arith.constant 0 : index
    %c0_15 = arith.constant 0 : index
    %41 = vector.load %arg4[%c0_14, %c0_15] : memref<18x128xf32, #tpu.memory_space<vmem>>, vector<1x128xf32>
    tpu.vector_store %arg4[%c0_14, %c0_15], %40 {strides = array<i32>} : memref<18x128xf32, #tpu.memory_space<vmem>>, vector<1x128xf32>,
    %42 = vector.extract_strided_slice %39 {offsets = [2, 0], sizes = [1, 128], strides = [1, 1]} : vector<82x128xf32> to vector<1x128xf32>
    %c1 = arith.constant 1 : index
    %c0_16 = arith.constant 0 : index
    %43 = vector.load %arg4[%c1, %c0_16] : memref<18x128xf32, #tpu.memory_space<vmem>>, vector<1x128xf32>
    tpu.vector_store %arg4[%c1, %c0_16], %42 {strides = array<i32>} : memref<18x128xf32, #tpu.memory_space<vmem>>, vector<1x128xf32>,
    %44 = vector.extract_strided_slice %39 {offsets = [4, 0], sizes = [1, 128], strides = [1, 1]} : vector<82x128xf32> to vector<1x128xf32>
    %c2 = arith.constant 2 : index
    %c0_17 = arith.constant 0 : index
    %45 = vector.load %arg4[%c2, %c0_17] : memref<18x128xf32, #tpu.memory_space<vmem>>, vector<1x128xf32>
    tpu.vector_store %arg4[%c2, %c0_17], %44 {strides = array<i32>} : memref<18x128xf32, #tpu.memory_space<vmem>>, vector<1x128xf32>,
    %46 = vector.extract_strided_slice %39 {offsets = [14, 0], sizes = [1, 128], strides = [1, 1]} : vector<82x128xf32> to vector<1x128xf32>
    %c3 = arith.constant 3 : index
    %c0_18 = arith.constant 0 : index
    %47 = vector.load %arg4[%c3, %c0_18] : memref<18x128xf32, #tpu.memory_space<vmem>>, vector<1x128xf32>
    tpu.vector_store %arg4[%c3, %c0_18], %46 {strides = array<i32>} : memref<18x128xf32, #tpu.memory_space<vmem>>, vector<1x128xf32>,
    %48 = vector.extract_strided_slice %39 {offsets = [16, 0], sizes = [1, 128], strides = [1, 1]} : vector<82x128xf32> to vector<1x128xf32>
    %c4 = arith.constant 4 : index
    %c0_19 = arith.constant 0 : index
    %49 = vector.load %arg4[%c4, %c0_19] : memref<18x128xf32, #tpu.memory_space<vmem>>, vector<1x128xf32>
    tpu.vector_store %arg4[%c4, %c0_19], %48 {strides = array<i32>} : memref<18x128xf32, #tpu.memory_space<vmem>>, vector<1x128xf32>,
    %50 = vector.extract_strided_slice %39 {offsets = [18, 0], sizes = [1, 128], strides = [1, 1]} : vector<82x128xf32> to vector<1x128xf32>
    %c5 = arith.constant 5 : index
    %c0_20 = arith.constant 0 : index
    %51 = vector.load %arg4[%c5, %c0_20] : memref<18x128xf32, #tpu.memory_space<vmem>>, vector<1x128xf32>
    tpu.vector_store %arg4[%c5, %c0_20], %50 {strides = array<i32>} : memref<18x128xf32, #tpu.memory_space<vmem>>, vector<1x128xf32>,
    %52 = vector.extract_strided_slice %39 {offsets = [28, 0], sizes = [1, 128], strides = [1, 1]} : vector<82x128xf32> to vector<1x128xf32>
    %c6 = arith.constant 6 : index
    %c0_21 = arith.constant 0 : index
    %53 = vector.load %arg4[%c6, %c0_21] : memref<18x128xf32, #tpu.memory_space<vmem>>, vector<1x128xf32>
    tpu.vector_store %arg4[%c6, %c0_21], %52 {strides = array<i32>} : memref<18x128xf32, #tpu.memory_space<vmem>>, vector<1x128xf32>,
    %54 = vector.extract_strided_slice %39 {offsets = [30, 0], sizes = [1, 128], strides = [1, 1]} : vector<82x128xf32> to vector<1x128xf32>
    %c7 = arith.constant 7 : index
    %c0_22 = arith.constant 0 : index
    %55 = vector.load %arg4[%c7, %c0_22] : memref<18x128xf32, #tpu.memory_space<vmem>>, vector<1x128xf32>
    tpu.vector_store %arg4[%c7, %c0_22], %54 {strides = array<i32>} : memref<18x128xf32, #tpu.memory_space<vmem>>, vector<1x128xf32>,
    %56 = vector.extract_strided_slice %39 {offsets = [32, 0], sizes = [1, 128], strides = [1, 1]} : vector<82x128xf32> to vector<1x128xf32>
    %c8 = arith.constant 8 : index
    %c0_23 = arith.constant 0 : index
    %57 = vector.load %arg4[%c8, %c0_23] : memref<18x128xf32, #tpu.memory_space<vmem>>, vector<1x128xf32>
    tpu.vector_store %arg4[%c8, %c0_23], %56 {strides = array<i32>} : memref<18x128xf32, #tpu.memory_space<vmem>>, vector<1x128xf32>,
    %58 = vector.extract_strided_slice %39 {offsets = [49, 0], sizes = [1, 128], strides = [1, 1]} : vector<82x128xf32> to vector<1x128xf32>
    %c9 = arith.constant 9 : index
    %c0_24 = arith.constant 0 : index
    %59 = vector.load %arg4[%c9, %c0_24] : memref<18x128xf32, #tpu.memory_space<vmem>>, vector<1x128xf32>
    tpu.vector_store %arg4[%c9, %c0_24], %58 {strides = array<i32>} : memref<18x128xf32, #tpu.memory_space<vmem>>, vector<1x128xf32>,
    %60 = vector.extract_strided_slice %39 {offsets = [51, 0], sizes = [1, 128], strides = [1, 1]} : vector<82x128xf32> to vector<1x128xf32>
    %c10 = arith.constant 10 : index
    %c0_25 = arith.constant 0 : index
    %61 = vector.load %arg4[%c10, %c0_25] : memref<18x128xf32, #tpu.memory_space<vmem>>, vector<1x128xf32>
    tpu.vector_store %arg4[%c10, %c0_25], %60 {strides = array<i32>} : memref<18x128xf32, #tpu.memory_space<vmem>>, vector<1x128xf32>,
    %62 = vector.extract_strided_slice %39 {offsets = [53, 0], sizes = [1, 128], strides = [1, 1]} : vector<82x128xf32> to vector<1x128xf32>
    %c11 = arith.constant 11 : index
    %c0_26 = arith.constant 0 : index
    %63 = vector.load %arg4[%c11, %c0_26] : memref<18x128xf32, #tpu.memory_space<vmem>>, vector<1x128xf32>
    tpu.vector_store %arg4[%c11, %c0_26], %62 {strides = array<i32>} : memref<18x128xf32, #tpu.memory_space<vmem>>, vector<1x128xf32>,
    %64 = vector.extract_strided_slice %39 {offsets = [63, 0], sizes = [1, 128], strides = [1, 1]} : vector<82x128xf32> to vector<1x128xf32>
    %c12 = arith.constant 12 : index
    %c0_27 = arith.constant 0 : index
    %65 = vector.load %arg4[%c12, %c0_27] : memref<18x128xf32, #tpu.memory_space<vmem>>, vector<1x128xf32>
    tpu.vector_store %arg4[%c12, %c0_27], %64 {strides = array<i32>} : memref<18x128xf32, #tpu.memory_space<vmem>>, vector<1x128xf32>,
    %66 = vector.extract_strided_slice %39 {offsets = [65, 0], sizes = [1, 128], strides = [1, 1]} : vector<82x128xf32> to vector<1x128xf32>
    %c13 = arith.constant 13 : index
    %c0_28 = arith.constant 0 : index
    %67 = vector.load %arg4[%c13, %c0_28] : memref<18x128xf32, #tpu.memory_space<vmem>>, vector<1x128xf32>
    tpu.vector_store %arg4[%c13, %c0_28], %66 {strides = array<i32>} : memref<18x128xf32, #tpu.memory_space<vmem>>, vector<1x128xf32>,
    %68 = vector.extract_strided_slice %39 {offsets = [67, 0], sizes = [1, 128], strides = [1, 1]} : vector<82x128xf32> to vector<1x128xf32>
    %c14 = arith.constant 14 : index
    %c0_29 = arith.constant 0 : index
    %69 = vector.load %arg4[%c14, %c0_29] : memref<18x128xf32, #tpu.memory_space<vmem>>, vector<1x128xf32>
    tpu.vector_store %arg4[%c14, %c0_29], %68 {strides = array<i32>} : memref<18x128xf32, #tpu.memory_space<vmem>>, vector<1x128xf32>,
    %70 = vector.extract_strided_slice %39 {offsets = [77, 0], sizes = [1, 128], strides = [1, 1]} : vector<82x128xf32> to vector<1x128xf32>
    %c15 = arith.constant 15 : index
    %c0_30 = arith.constant 0 : index
    %71 = vector.load %arg4[%c15, %c0_30] : memref<18x128xf32, #tpu.memory_space<vmem>>, vector<1x128xf32>
    tpu.vector_store %arg4[%c15, %c0_30], %70 {strides = array<i32>} : memref<18x128xf32, #tpu.memory_space<vmem>>, vector<1x128xf32>,
    %72 = vector.extract_strided_slice %39 {offsets = [79, 0], sizes = [1, 128], strides = [1, 1]} : vector<82x128xf32> to vector<1x128xf32>
    %c16 = arith.constant 16 : index
    %c0_31 = arith.constant 0 : index
    %73 = vector.load %arg4[%c16, %c0_31] : memref<18x128xf32, #tpu.memory_space<vmem>>, vector<1x128xf32>
    tpu.vector_store %arg4[%c16, %c0_31], %72 {strides = array<i32>} : memref<18x128xf32, #tpu.memory_space<vmem>>, vector<1x128xf32>,
    %74 = vector.extract_strided_slice %39 {offsets = [81, 0], sizes = [1, 128], strides = [1, 1]} : vector<82x128xf32> to vector<1x128xf32>
    %c17 = arith.constant 17 : index
    %c0_32 = arith.constant 0 : index
    %75 = vector.load %arg4[%c17, %c0_32] : memref<18x128xf32, #tpu.memory_space<vmem>>, vector<1x128xf32>
    tpu.vector_store %arg4[%c17, %c0_32], %74 {strides = array<i32>} : memref<18x128xf32, #tpu.memory_space<vmem>>, vector<1x128xf32>,
    return
  }
}

</mosaic_0001>

<bundles_post_ra>
// kernel: first_conv_block.1
= control target key start
LH: loop header
LB: loop body
LE: loop exit
PB: predicated region body
PF: predicated region fallthrough
CT: control target
= control target key end

     0   :  { %v623_v0 = vmov 0.0   ;;  %vm624_vm0 = vmmov 0   ;;  %vm106_vm1 = vcmask 1041408   ;;  %vm84_vm2 = vcmask 293888   ;;  %s988_s1 = inlined_call_operand.vmem [shape: bf16[36,128], index: 1, kind: input, shape index: {}]   ;;  %s989_s0 = inlined_call_operand.vmem [shape: bf16[98,36], index: 0, kind: input, shape index: {}]   ;;  %s990_s2 = inlined_call_operand.vmem [shape: f32[1,128], index: 2, kind: input, shape index: {}]   ;;  %s991_s3 = inlined_call_operand.vmem [shape: f32[1,128], index: 3, kind: input, shape index: {}]   ;;  %s992_s4 = inlined_call_operand.vmem [shape: f32[18,128], index: 4, kind: output, shape index: {}]  }
   0x1   :  { %569 = vmatprep.subr.bf16.mxu0 %v623_v0  ;;  %v611_v1 = vld [vmem:[%s988_s1] sm:$0xff]   ;;  %575 = vmatprep.mubr.msk.bf16.mxu0 %vm624_vm0, %v623_v0  ;;  %v612_v2 = vld [vmem:[%s988_s1 + $0x8] sm:$0xff]   ;;  %v613_v3 = vld [vmem:[%s988_s1 + $0x10] ss:$0 sps:$4 sm:$0x33]   ;;  %vm325_vm3 = vcmask 1046528  }
   0x2   :  { %603 = vmatprep.subr.bf16.mxu1 %v623_v0  ;;  %591 = vmatprep.mubr.msk.bf16.mxu1 %vm624_vm0, %v623_v0  ;;  %v108_v4 = vsel %vm106_vm1, %v613_v3, 0  ;;  %v614_v5 = vld [vmem:[%s989_s0] sm:$0xff]   ;;  %v615_v7 = vld [vmem:[%s989_s0 + $0x8] sm:$0xff]   ;;  %v616_v9 = vld [vmem:[%s989_s0 + $0x10] sm:$0xff]   ;;  %vm375_vm4 = vcmask 1045504   ;;  %vm437_vm5 = vcmask 1040384  }
   0x3   :  { %570 = vmatpush3.bf16.msra.mxu0 %v611_v1  ;;  %606 = vmatpush3.bf16.msra.mxu1 %v611_v1  ;;  %v617_v6 = vld [vmem:[%s989_s0 + $0x20] sm:$0xff]   ;;  %v619_v8 = vld [vmem:[%s989_s0 + $0x28] sm:$0xff]   ;;  %v620_v10 = vld [vmem:[%s989_s0 + $0x30] ss:$0 sps:$4 sm:$0x11]  }
   0x4   :  { %571 = vmatprep.subr.bf16.mxu0 %v623_v0  ;;  %604 = vmatprep.subr.bf16.mxu1 %v623_v0  ;;  %v618_v11 = vld [vmem:[%s989_s0 + $0x18] sm:$0xff]  }
   0x7   :  { %572 = vmatpush3.bf16.msra.mxu0 %v612_v2  ;;  %607 = vmatpush3.bf16.msra.mxu1 %v612_v2 }
   0x8   :  { %573 = vmatprep.subr.bf16.mxu0 %v623_v0  ;;  %605 = vmatprep.subr.bf16.mxu1 %v623_v0 }
   0xb   :  { %574 = vmatpush3.bf16.msra.mxu0 %v108_v4  ;;  %608 = vmatpush3.bf16.msra.mxu1 %v108_v4 }
   0xe   :  { %576 = vmatmul.mubr.msk.bf16.vlgmr.msra.gmra.mrb[0].mxu0 %vm84_vm2, %v614_v5  ;;  %592 = vmatmul.mubr.msk.bf16.vlgmr.msra.gmra.mrb[0].mxu1 %vm84_vm2, %v617_v6 }
   0xf   :  { %579 = vmatprep.mubr.msk.bf16.mxu0 %vm624_vm0, %v623_v0  ;;  %595 = vmatprep.mubr.msk.bf16.mxu1 %vm624_vm0, %v623_v0 }
  0x16   :  { %580 = vmatmul.mubr.msk.bf16.gmra.mrb[4].mxu0 %vm84_vm2, %v615_v7  ;;  %596 = vmatmul.mubr.msk.bf16.gmra.mrb[4].mxu1 %vm84_vm2, %v619_v8 }
  0x17   :  { %583 = vmatprep.mubr.msk.bf16.mxu0 %vm624_vm0, %v623_v0  ;;  %599 = vmatprep.mubr.msk.bf16.mxu1 %vm624_vm0, %v623_v0 }
  0x1e   :  { %584 = vmatmul.mubr.msk.bf16.gmra.mrb[8].mxu0 %vm84_vm2, %v616_v9  ;;  %600 = vmatmul.mubr.msk.bf16.gmra.mrb[8].mxu1 %vm84_vm2, %v620_v10 }
  0x1f   :  { %587 = vmatprep.mubr.msk.bf16.mxu0 %vm624_vm0, %v623_v0 }
  0x26   :  { %588 = vmatmul.mubr.msk.bf16.gmra.mrb[12].mxu0 %vm84_vm2, %v618_v11 }
  0xe1   :  { %v695_v12 = vpop.f32.mrb[0].mxu0  ;;  %v697_v13 = vpop.f32.mrb[0].mxu1 }
  0xe2   :  { %v577_v14 = vpop.f32.mrb[1].mxu0  ;;  %v593_v15 = vpop.f32.mrb[1].mxu1  ;;  %v217_v18 = vmul.f32 %v695_v12, %v695_v12  ;;  %v225_v61 = vmul.f32 %v697_v13, %v697_v13 }
  0xe3   :  { %v699_v16 = vpop.f32.mrb[2].mxu0  ;;  %v701_v17 = vpop.f32.mrb[2].mxu1 }
  0xe4   :  { %v198_v19 = vadd.f32 %v699_v16, %v695_v12  ;;  %v218_v20 = vmul.f32 %v699_v16, %v699_v16  ;;  %v578_v21 = vpop.f32.mrb[3].mxu0  ;;  %v594_v22 = vpop.f32.mrb[3].mxu1  ;;  %v226_v0 = vmul.f32 %v701_v17, %v701_v17 }
  0xe6   :  { %v230_v23 = vadd.f32 %v218_v20, %v217_v18 }
  0xe9   :  { %v709_v24 = vpop.f32.mrb[4].mxu0  ;;  %v711_v25 = vpop.f32.mrb[4].mxu1 }
  0xea   :  { %v199_v26 = vadd.f32 %v198_v19, %v709_v24  ;;  %v219_v27 = vmul.f32 %v709_v24, %v709_v24  ;;  %v581_v28 = vpop.f32.mrb[5].mxu0  ;;  %v597_v29 = vpop.f32.mrb[5].mxu1  ;;  %v227_v4 = vmul.f32 %v711_v25, %v711_v25 }
  0xeb   :  { %v716_v30 = vpop.f32.mrb[6].mxu0  ;;  %v718_v31 = vpop.f32.mrb[6].mxu1 }
  0xec   :  { %v231_v32 = vadd.f32 %v230_v23, %v219_v27  ;;  %v200_v33 = vadd.f32 %v199_v26, %v716_v30  ;;  %v220_v34 = vmul.f32 %v716_v30, %v716_v30  ;;  %v582_v35 = vpop.f32.mrb[7].mxu0  ;;  %v598_v36 = vpop.f32.mrb[7].mxu1  ;;  %v228_v9 = vmul.f32 %v718_v31, %v718_v31 }
  0xee   :  { %v232_v37 = vadd.f32 %v231_v32, %v220_v34 }
  0xf1   :  { %v723_v38 = vpop.f32.mrb[8].mxu0  ;;  %v725_v39 = vpop.f32.mrb[8].mxu1 }
  0xf2   :  { %v201_v40 = vadd.f32 %v200_v33, %v723_v38  ;;  %v221_v41 = vmul.f32 %v723_v38, %v723_v38  ;;  %v585_v42 = vpop.f32.mrb[9].mxu0  ;;  %v601_v43 = vpop.f32.mrb[9].mxu1  ;;  %v229_v3 = vmul.f32 %v725_v39, %v725_v39  ;;  %v209_v7 = vsel %vm106_vm1, %v725_v39, 0.0 }
  0xf3   :  { %v730_v44 = vpop.f32.mrb[10].mxu0  ;;  %v195_v45 = vpop.f32.mrb[10].mxu1  ;;  %v262_v43 = vlaneseq }
  0xf4   :  { %v233_v46 = vadd.f32 %v232_v37, %v221_v41  ;;  %v202_v47 = vadd.f32 %v201_v40, %v730_v44  ;;  %v222_v48 = vmul.f32 %v730_v44, %v730_v44  ;;  %v586_v49 = vpop.f32.mrb[11].mxu0  ;;  %v602_v50 = vpop.f32.mrb[11].mxu1  ;;  %v241_v11 = vsel %vm106_vm1, %v229_v3, 0.0 }
  0xf5   :  { %v263_v45 = vshrl.u32 %v262_v43, 7  ;;  %v258_v50 = vld [vmem:[%s991_s3] sm:$0x1] }
  0xf6   :  { %v234_v51 = vadd.f32 %v233_v46, %v222_v48  ;;  %v254_v46 = vld [vmem:[%s990_s2] sm:$0x1] }
  0xf9   :  { %v735_v52 = vpop.f32.mrb[12].mxu0 }
  0xfa   :  { %v203_v53 = vadd.f32 %v202_v47, %v735_v52  ;;  %v223_v54 = vmul.f32 %v735_v52, %v735_v52  ;;  %v589_v55 = vpop.f32.mrb[13].mxu0  ;;  %v264_v47 = vsub.s32 0, %v263_v45 }
  0xfb   :  { %v171_v56 = vpop.f32.mrb[14].mxu0 }
  0xfc   :  { %v235_v57 = vadd.f32 %v234_v51, %v223_v54  ;;  %v204_v58 = vadd.f32 %v203_v53, %v171_v56  ;;  %v224_v59 = vmul.f32 %v171_v56, %v171_v56  ;;  %v590_v60 = vpop.f32.mrb[15].mxu0 }
  0xfe   :  { %v205_v62 = vadd.f32 %v204_v58, %v697_v13  ;;  %v236_v63 = vadd.f32 %v235_v57, %v224_v59 }
 0x100   :  { %v237_v1 = vadd.f32 %v236_v63, %v225_v61  ;;  %v206_v2 = vadd.f32 %v205_v62, %v701_v17 }
 0x102   :  { %v207_v5 = vadd.f32 %v206_v2, %v711_v25  ;;  %v238_v6 = vadd.f32 %v237_v1, %v226_v0 }
 0x104   :  { %v208_v8 = vadd.f32 %v207_v5, %v718_v31  ;;  %v239_v10 = vadd.f32 %v238_v6, %v227_v4 }
 0x106   :  { %v240_v14 = vadd.f32 %v239_v10, %v228_v9  ;;  %v210_v15 = vadd.f32 %v209_v7, %v208_v8 }
 0x108   :  { %v211_v18 = vrot.slane %v210_v15, 4  ;;  %v242_v19 = vadd.f32 %v241_v11, %v240_v14 }
 0x10a   :  { %v212_v20 = vadd.f32 %v211_v18, %v210_v15  ;;  %v243_v21 = vrot.slane %v242_v19, 4 }
 0x10c   :  { %v213_v22 = vrot.slane %v212_v20, 2  ;;  %v244_v23 = vadd.f32 %v243_v21, %v242_v19 }
 0x10e   :  { %v214_v26 = vadd.f32 %v213_v22, %v212_v20  ;;  %v245_v27 = vrot.slane %v244_v23, 2 }
 0x110   :  { %v215_v28 = vrot.slane %v214_v26, 1  ;;  %v246_v29 = vadd.f32 %v245_v27, %v244_v23 }
 0x112   :  { %v216_v32 = vadd.f32 %v215_v28, %v214_v26  ;;  %v247_v33 = vrot.slane %v246_v29, 1 }
 0x114   :  { %v248_v34 = vadd.f32 %v247_v33, %v246_v29  ;;  %v249_v35 = vmul.f32 0.010204081, %v216_v32 }
 0x116   :  { %v250_v36 = vmul.f32 0.010204081, %v248_v34  ;;  %v251_v37 = vmul.f32 %v249_v35, %v249_v35 }
 0x118   :  { %v252_v40 = vsub.f32 %v250_v36, %v251_v37 }
 0x11a   :  { %v253_v41 = vmax.f32 %v252_v40, 0.0 }
 0x11c   :  { %v255_v42 = vadd.f32 1e-05, %v253_v41 }
 0x11e   :  { %621 = vrsqrt.f32 %v255_v42 }
 0x128   :  { %v622_v48 = vpop.eup %621 }
 0x129   :  { %v257_v49 = vmul.f32 %v622_v48, %v254_v46 }
 0x12b   :  { %v259_v51 = vmul.f32 %v257_v49, %v249_v35  ;;  %v265_v53 = vrot.slane %v257_v49, %v264_v47 }
 0x12d   :  { %v260_v54 = vsub.f32 %v258_v50, %v259_v51  ;;  %v267_v55 = vmul.f32 %v265_v53, %v695_v12  ;;  %v268_v57 = vmul.f32 %v265_v53, %v699_v16  ;;  %v269_v58 = vmul.f32 %v265_v53, %v709_v24 }
 0x12e   :  { %v270_v59 = vmul.f32 %v265_v53, %v716_v30  ;;  %v271_v60 = vmul.f32 %v265_v53, %v723_v38  ;;  %v272_v61 = vmul.f32 %v265_v53, %v730_v44  ;;  %v273_v62 = vmul.f32 %v265_v53, %v735_v52 }
 0x12f   :  { %v274_v63 = vmul.f32 %v265_v53, %v171_v56  ;;  %v275_v0 = vmul.f32 %v265_v53, %v697_v13  ;;  %v276_v1 = vmul.f32 %v265_v53, %v701_v17  ;;  %v277_v2 = vmul.f32 %v265_v53, %v711_v25 }
 0x130   :  { %v278_v12 = vmul.f32 %v265_v53, %v718_v31  ;;  %v279_v16 = vmul.f32 %v265_v53, %v725_v39  ;;  %v284_v24 = vrot.slane %v260_v54, %v264_v47 }
 0x132   :  { %v286_v30 = vadd.f32 %v284_v24, %v267_v55  ;;  %v287_v3 = vadd.f32 %v284_v24, %v268_v57  ;;  %v288_v38 = vadd.f32 %v284_v24, %v269_v58  ;;  %v289_v4 = vadd.f32 %v284_v24, %v270_v59 }
 0x133   :  { %v290_v44 = vadd.f32 %v284_v24, %v271_v60  ;;  %v291_v5 = vadd.f32 %v284_v24, %v272_v61  ;;  %v292_v52 = vadd.f32 %v284_v24, %v273_v62  ;;  %v293_v56 = vadd.f32 %v284_v24, %v274_v63 }
 0x134   :  { %v294_v6 = vadd.f32 %v284_v24, %v275_v0  ;;  %v295_v13 = vadd.f32 %v284_v24, %v276_v1  ;;  %v296_v7 = vadd.f32 %v284_v24, %v277_v2  ;;  %v297_v17 = vadd.f32 %v284_v24, %v278_v12 }
 0x135   :  { %v775_v8 = vadd.f32 %v284_v24, %v279_v16  ;;  %v777_v25 = vmax.f32 %v286_v30, 0.0  ;;  %v779_v31 = vmax.f32 %v287_v3, 0.0  ;;  %v781_v39 = vmax.f32 %v288_v38, 0.0 }
 0x136   :  { %v783_v9 = vmax.f32 %v289_v4, 0.0  ;;  %v785_v10 = vmax.f32 %v290_v44, 0.0  ;;  %v787_v11 = vmax.f32 %v291_v5, 0.0  ;;  %v789_v14 = vmax.f32 %v292_v52, 0.0 }
 0x137   :  { %v791_v15 = vmax.f32 %v293_v56, 0.0  ;;  %v793_v18 = vmax.f32 %v294_v6, 0.0  ;;  %v795_v19 = vmax.f32 %v295_v13, 0.0  ;;  %v797_v20 = vmax.f32 %v296_v7, 0.0 }
 0x138   :  { %v799_v21 = vmax.f32 %v297_v17, 0.0  ;;  %v311_v22 = vmax.f32 %v775_v8, 0.0  ;;  %v326_v23 = vrot.slane %v777_v25, 1  ;;  %v327_v26 = vrot.slane %v779_v31, 1 }
 0x139   :  { %v329_v27 = vrot.slane %v781_v39, 1  ;;  %v331_v28 = vrot.slane %v783_v9, 1  ;;  %v333_v29 = vrot.slane %v785_v10, 1  ;;  %v335_v32 = vrot.slane %v787_v11, 1 }
 0x13a   :  { %v328_v33 = vsel %vm325_vm3, %v326_v23, %v327_v26  ;;  %v337_v34 = vrot.slane %v789_v14, 1  ;;  %v339_v35 = vrot.slane %v791_v15, 1  ;;  %v341_v36 = vrot.slane %v793_v18, 1 }
 0x13b   :  { %v330_v37 = vsel %vm325_vm3, %v327_v26, %v329_v27  ;;  %v332_v40 = vsel %vm325_vm3, %v329_v27, %v331_v28  ;;  %v334_v41 = vsel %vm325_vm3, %v331_v28, %v333_v29  ;;  %v336_v42 = vsel %vm325_vm3, %v333_v29, %v335_v32 }
 0x13c   :  { %v338_v43 = vsel %vm325_vm3, %v335_v32, %v337_v34  ;;  %v340_v45 = vsel %vm325_vm3, %v337_v34, %v339_v35  ;;  %v342_v46 = vsel %vm325_vm3, %v339_v35, %v341_v36  ;;  %v343_v47 = vrot.slane %v795_v19, 1 }
 0x13d   :  { %v345_v48 = vrot.slane %v797_v20, 1  ;;  %v347_v49 = vrot.slane %v799_v21, 1  ;;  %v349_v50 = vrot.slane %v311_v22, 1  ;;  %v363_v51 = vmax.f32 %v777_v25, %v328_v33 }
 0x13e   :  { %v344_v53 = vsel %vm325_vm3, %v341_v36, %v343_v47  ;;  %v364_v54 = vmax.f32 %v779_v31, %v330_v37  ;;  %v365_v55 = vmax.f32 %v781_v39, %v332_v40  ;;  %v366_v57 = vmax.f32 %v783_v9, %v334_v41 }
 0x13f   :  { %v346_v58 = vsel %vm325_vm3, %v343_v47, %v345_v48  ;;  %v348_v59 = vsel %vm325_vm3, %v345_v48, %v347_v49  ;;  %v350_v60 = vsel %vm325_vm3, %v347_v49, %v349_v50  ;;  %v367_v61 = vmax.f32 %v785_v10, %v336_v42 }
 0x140   :  { %v368_v62 = vmax.f32 %v787_v11, %v338_v43  ;;  %v369_v63 = vmax.f32 %v789_v14, %v340_v45  ;;  %v370_v0 = vmax.f32 %v791_v15, %v342_v46  ;;  %v371_v1 = vmax.f32 %v793_v18, %v344_v53 }
 0x141   :  { %v372_v2 = vmax.f32 %v795_v19, %v346_v58  ;;  %v373_v12 = vmax.f32 %v797_v20, %v348_v59  ;;  %v374_v16 = vmax.f32 %v799_v21, %v350_v60  ;;  %v376_v24 = vrot.slane %v777_v25, 2 }
 0x142   :  { %v377_v30 = vrot.slane %v779_v31, 2  ;;  %v379_v3 = vrot.slane %v781_v39, 2  ;;  %v381_v38 = vrot.slane %v783_v9, 2  ;;  %v383_v4 = vrot.slane %v785_v10, 2 }
 0x143   :  { %v385_v44 = vrot.slane %v787_v11, 2  ;;  %v387_v5 = vrot.slane %v789_v14, 2  ;;  %v389_v52 = vrot.slane %v791_v15, 2  ;;  %v391_v56 = vrot.slane %v793_v18, 2 }
 0x144   :  { %v378_v6 = vsel %vm375_vm4, %v376_v24, %v377_v30  ;;  %v380_v13 = vsel %vm375_vm4, %v377_v30, %v379_v3  ;;  %v382_v7 = vsel %vm375_vm4, %v379_v3, %v381_v38  ;;  %v384_v17 = vsel %vm375_vm4, %v381_v38, %v383_v4 }
 0x145   :  { %v386_v8 = vsel %vm375_vm4, %v383_v4, %v385_v44  ;;  %v388_v25 = vsel %vm375_vm4, %v385_v44, %v387_v5  ;;  %v390_v31 = vsel %vm375_vm4, %v387_v5, %v389_v52  ;;  %v392_v39 = vsel %vm375_vm4, %v389_v52, %v391_v56 }
 0x146   :  { %v393_v9 = vrot.slane %v795_v19, 2  ;;  %v395_v10 = vrot.slane %v797_v20, 2  ;;  %v397_v11 = vrot.slane %v799_v21, 2  ;;  %v399_v14 = vrot.slane %v311_v22, 2 }
 0x147   :  { %v858_v15 = vmax.f32 %v363_v51, %v378_v6  ;;  %v860_v18 = vmax.f32 %v364_v54, %v380_v13  ;;  %v862_v23 = vmax.f32 %v365_v55, %v382_v7  ;;  %v864_v26 = vmax.f32 %v366_v57, %v384_v17 }
 0x148   :  { %v394_v27 = vsel %vm375_vm4, %v391_v56, %v393_v9  ;;  %v396_v28 = vsel %vm375_vm4, %v393_v9, %v395_v10  ;;  %v398_v29 = vsel %vm375_vm4, %v395_v10, %v397_v11  ;;  %v400_v19 = vsel %vm375_vm4, %v397_v11, %v399_v14 }
 0x149   :  { %v870_v20 = vmax.f32 %v367_v61, %v386_v8  ;;  %v418_v21 = vmax.f32 %v368_v62, %v388_v25  ;;  %v872_v22 = vmax.f32 %v369_v63, %v390_v31  ;;  %v874_v32 = vmax.f32 %v370_v0, %v392_v39 }
 0x14a   :  { %v876_v33 = vmax.f32 %v371_v1, %v394_v27  ;;  %v878_v34 = vmax.f32 %v372_v2, %v396_v28  ;;  %v880_v35 = vmax.f32 %v373_v12, %v398_v29  ;;  %v882_v36 = vmax.f32 %v374_v16, %v400_v19 }
 0x14b   :  { %v438_v37 = vrot.slane %v858_v15, 7  ;;  %v439_v40 = vrot.slane %v860_v18, 7  ;;  %v441_v41 = vrot.slane %v862_v23, 7  ;;  %v443_v42 = vrot.slane %v864_v26, 7 }
 0x14c   :  { %v445_v43 = vrot.slane %v870_v20, 7  ;;  %v447_v45 = vrot.slane %v418_v21, 7  ;;  %v449_v46 = vrot.slane %v872_v22, 7  ;;  %v450_v47 = vrot.slane %v874_v32, 7 }
 0x14d   :  { %v440_v48 = vsel %vm437_vm5, %v438_v37, %v439_v40  ;;  %v442_v49 = vsel %vm437_vm5, %v439_v40, %v441_v41  ;;  %v444_v50 = vsel %vm437_vm5, %v441_v41, %v443_v42  ;;  %v452_v51 = vrot.slane %v876_v33, 7 }
 0x14e   :  { %v446_v53 = vsel %vm437_vm5, %v443_v42, %v445_v43  ;;  %v448_v54 = vsel %vm437_vm5, %v445_v43, %v447_v45  ;;  %v451_v55 = vsel %vm437_vm5, %v449_v46, %v450_v47  ;;  %v454_v57 = vrot.slane %v878_v34, 7 }
 0x14f   :  { %v453_v58 = vsel %vm437_vm5, %v450_v47, %v452_v51  ;;  %v456_v59 = vrot.slane %v880_v35, 7  ;;  %v458_v60 = vrot.slane %v882_v36, 7  ;;  %v470_v61 = vmax.f32 %v858_v15, %v440_v48 }
 0x150   :  { %v455_v62 = vsel %vm437_vm5, %v452_v51, %v454_v57  ;;  %v471_v63 = vmax.f32 %v860_v18, %v442_v49  ;;  %v472_v0 = vmax.f32 %v862_v23, %v444_v50  ;;  %v473_v1 = vmax.f32 %v864_v26, %v446_v53 }
 0x151   :  { %v457_v2 = vsel %vm437_vm5, %v454_v57, %v456_v59  ;;  %v459_v12 = vsel %vm437_vm5, %v456_v59, %v458_v60  ;;  %v474_v16 = vmax.f32 %v870_v20, %v448_v54  ;;  %v475_v24 = vmax.f32 %v872_v22, %v451_v55 }
 0x152   :  { %v476_v30 = vmax.f32 %v874_v32, %v453_v58  ;;  %v477_v3 = vmax.f32 %v876_v33, %v455_v62  ;;  %v478_v38 = vmax.f32 %v878_v34, %v457_v2  ;;  %v479_v4 = vmax.f32 %v880_v35, %v459_v12 }
 0x153   :  { %v480_v44 = vrot.slane %v860_v18, 6  ;;  %v481_v5 = vrot.slane %v862_v23, 6  ;;  %v483_v52 = vrot.slane %v864_v26, 6  ;;  %v485_v56 = vrot.slane %v870_v20, 6 }
 0x154   :  { %v487_v6 = vrot.slane %v418_v21, 6  ;;  %v489_v13 = vrot.slane %v872_v22, 6  ;;  %v491_v7 = vrot.slane %v874_v32, 6  ;;  %v492_v17 = vrot.slane %v876_v33, 6 }
 0x155   :  { %v482_v8 = vsel %vm106_vm1, %v480_v44, %v481_v5  ;;  %v484_v25 = vsel %vm106_vm1, %v481_v5, %v483_v52  ;;  %v486_v31 = vsel %vm106_vm1, %v483_v52, %v485_v56  ;;  %v494_v39 = vrot.slane %v878_v34, 6 }
 0x156   :  { %v488_v9 = vsel %vm106_vm1, %v485_v56, %v487_v6  ;;  %v490_v10 = vsel %vm106_vm1, %v487_v6, %v489_v13  ;;  %v493_v11 = vsel %vm106_vm1, %v491_v7, %v492_v17  ;;  %v496_v14 = vrot.slane %v880_v35, 6 }
 0x157   :  { %v495_v15 = vsel %vm106_vm1, %v492_v17, %v494_v39  ;;  %v498_v18 = vrot.slane %v882_v36, 6  ;;  %v510_v23 = vmax.f32 %v470_v61, %v482_v8  ;;  %v511_v26 = vmax.f32 %v471_v63, %v484_v25 }
 0x158   :  { %v497_v27 = vsel %vm106_vm1, %v494_v39, %v496_v14  ;;  %v512_v28 = vmax.f32 %v472_v0, %v486_v31  ;;  %v513_v29 = vmax.f32 %v473_v1, %v488_v9  ;;  %v514_v19 = vmax.f32 %v474_v16, %v490_v10 }
 0x159   :  { %v499_v20 = vsel %vm106_vm1, %v496_v14, %v498_v18  ;;  %v515_v21 = vmax.f32 %v475_v24, %v493_v11  ;;  %v516_v22 = vmax.f32 %v476_v30, %v495_v15  ;;  %v517_v32 = vmax.f32 %v477_v3, %v497_v27  ;;  %520 = vst [vmem:[%s992_s4] sm:$0x1] %v510_v23 }
 0x15a   :  { %521 = vst [vmem:[%s992_s4 - $0x1] sm:$0x4] %v510_v23  ;;  %522 = vst [vmem:[%s992_s4 - $0x2] sm:$0x10] %v510_v23  ;;  %v518_v33 = vmax.f32 %v478_v38, %v499_v20  ;;  %v519_v34 = vmax.f32 %v479_v4, %v498_v18 }
 0x15b   :  { %523 = vst [vmem:[%s992_s4 - $0x3] sm:$0x40] %v511_v26  ;;  %524 = vst [vmem:[%s992_s4 + $0x4] sm:$0x1] %v512_v28 }
 0x15c   :  { %525 = vst [vmem:[%s992_s4 + $0x3] sm:$0x4] %v512_v28  ;;  %526 = vst [vmem:[%s992_s4 + $0x2] sm:$0x10] %v513_v29 }
 0x15d   :  { %527 = vst [vmem:[%s992_s4 + $0x1] sm:$0x40] %v513_v29  ;;  %528 = vst [vmem:[%s992_s4 + $0x8] sm:$0x1] %v514_v19 }
 0x15e   :  { %529 = vst [vmem:[%s992_s4 + $0x8] sm:$0x2] %v515_v21  ;;  %530 = vst [vmem:[%s992_s4 + $0x7] sm:$0x8] %v515_v21 }
 0x15f   :  { %531 = vst [vmem:[%s992_s4 + $0x6] sm:$0x20] %v515_v21  ;;  %532 = vst [vmem:[%s992_s4 + $0x5] sm:$0x80] %v516_v22 }
 0x160   :  { %533 = vst [vmem:[%s992_s4 + $0xc] sm:$0x2] %v517_v32  ;;  %534 = vst [vmem:[%s992_s4 + $0xb] sm:$0x8] %v517_v32 }
 0x161   :  { %535 = vst [vmem:[%s992_s4 + $0xa] sm:$0x20] %v518_v33  ;;  %536 = vst [vmem:[%s992_s4 + $0x9] sm:$0x80] %v518_v33 }
 0x162   :  { %537 = vst [vmem:[%s992_s4 + $0x10] sm:$0x2] %v519_v34 }

</bundles_post_ra>
